<compile_context>
chip_gen: v5e
topology: v5e:2x2
jax: 0.10.0
libtpu: 0.0.40
codegen_flags: <defaults>
</compile_context>

<pallas_src>
import functools

import jax
import jax.numpy as jnp
from jax import lax
from jax.experimental import pallas as pl
from jax.experimental.pallas import tpu as pltpu


_LANE_CHUNK = 256                      # input columns per selection matmul (-> 128 out lanes)
_TARGET_BLOCK_BYTES = 2 * 1024 * 1024  # ~2 MiB of input per grid step


def _selection_matrices(cw, dtype):
    """0/1 matrices picking even / odd columns: S_even[w, j] = (w == 2j)."""
    w_idx = lax.broadcasted_iota(jnp.int32, (cw, cw // 2), 0)
    j_idx = lax.broadcasted_iota(jnp.int32, (cw, cw // 2), 1)
    s_even = (w_idx == 2 * j_idx).astype(dtype)
    s_odd = (w_idx == 2 * j_idx + 1).astype(dtype)
    return s_even, s_odd


def _maxpool2x2_kernel(x_ref, o_ref, *, width):
    """x_ref: (TR, 2*width)  [lanes 0..W-1 = top row, lanes W..2W-1 = bottom row]
       o_ref: (TR, width // 2)."""
    w = width
    sel_cache = {}
    for c0 in range(0, w, _LANE_CHUNK):            # static chunk loop over the width
        cw = min(_LANE_CHUNK, w - c0)
        if cw not in sel_cache:                    # all full chunks share the same S
            sel_cache[cw] = _selection_matrices(cw, x_ref.dtype)
        s_even, s_odd = sel_cache[cw]

        top = x_ref[:, c0:c0 + cw]                 # image row 2i
        bot = x_ref[:, w + c0:w + c0 + cw]         # image row 2i+1
        m = jnp.maximum(top, bot)                  # kh max (VPU, elementwise)

        # Even/odd lane de-interleave via exact 0/1 selection matmuls (idle MXU).
        ev = jnp.dot(m, s_even, preferred_element_type=jnp.float32,
                     precision=lax.Precision.HIGHEST)
        od = jnp.dot(m, s_odd, preferred_element_type=jnp.float32,
                     precision=lax.Precision.HIGHEST)
        o_ref[:, c0 // 2:(c0 + cw) // 2] = jnp.maximum(ev, od).astype(o_ref.dtype)


def custom_pooling_max(x, *, block_rows=None):
    """MaxPool2d(kernel_size=2, stride=2) on NCHW (or CHW) input via Pallas."""
    if x.ndim < 4:
        x = x.reshape((1,) + x.shape)              # matches the torch .view(1, ...) path
    b, c, h, w = x.shape
    ho, wo = h // 2, w // 2
    if ho == 0 or wo == 0:
        return jnp.zeros((b, c, ho, wo), dtype=x.dtype)
    if (h % 2) or (w % 2):                         # nn.MaxPool2d(2,2) floor-truncates odd dims
        x = x[:, :, :2 * ho, :2 * wo]

    wt = 2 * wo                                    # even (possibly truncated) width
    r = b * c * ho                                 # one row per output image-row
    xr = x.reshape(r, 2 * wt)                      # FREE reshape: [top row | bottom row]

    # Row-tile size: ~2 MiB of input per grid step, sublane aligned.
    itemsize = x.dtype.itemsize
    row_bytes = 2 * wt * itemsize
    if block_rows is None:
        tr = max(1, _TARGET_BLOCK_BYTES // row_bytes)
    else:
        tr = int(block_rows)
    if tr >= r:
        tr = r                                     # block dim == full dim is always legal
    else:
        mult = 8 * max(1, 4 // itemsize)           # 8 (f32) / 16 (bf16) / 32 (int8) sublanes
        tr = min(r, max(mult, (tr // mult) * mult))
    grid = (pl.cdiv(r, tr),)                       # partial tail block handled by masking

    out = pl.pallas_call(
        functools.partial(_maxpool2x2_kernel, width=wt),
        out_shape=jax.ShapeDtypeStruct((r, wo), x.dtype),
        grid=grid,
        in_specs=[pl.BlockSpec((tr, 2 * wt), lambda i: (i, 0))],
        out_specs=pl.BlockSpec((tr, wo), lambda i: (i, 0)),
        compiler_params=pltpu.CompilerParams(
            dimension_semantics=("parallel",),     # shards across both TCs on v7x
            vmem_limit_bytes=32 * 1024 * 1024,
        ),
    )(xr)
    return out.reshape(b, c, ho, wo)


if __name__ == "__main__":
    key = jax.random.PRNGKey(0)
    k1, k2, k3 = jax.random.split(key, 3)

    # Primary test: NCHW input consistent with the module's forward.
    x = jax.random.normal(k1, (2, 4, 16, 16), dtype=jnp.float32)
    y = custom_pooling_max(x)
    jax.block_until_ready(y)
    ref = jnp.max(x.reshape(2, 4, 8, 2, 8, 2), axis=(3, 5))
    assert y.shape == (2, 4, 8, 8)
    assert jnp.allclose(y, ref, rtol=1e-5, atol=1e-5), "max-pool mismatch (even dims)"

    # Odd spatial dims: nn.MaxPool2d(2,2) floor-truncates instead of raising.
    x2 = jax.random.normal(k2, (2, 3, 9, 7), dtype=jnp.float32)
    y2 = custom_pooling_max(x2)
    jax.block_until_ready(y2)
    ref2 = jnp.max(x2[:, :, :8, :6].reshape(2, 3, 4, 2, 3, 2), axis=(3, 5))
    assert y2.shape == (2, 3, 4, 3)
    assert jnp.allclose(y2, ref2, rtol=1e-5, atol=1e-5), "max-pool mismatch (odd dims)"

    # Exercise the multi-step grid + partial tail-block path (r=30 rows, tiles of 8).
    x3 = jax.random.normal(k3, (1, 3, 20, 32), dtype=jnp.float32)
    y3 = custom_pooling_max(x3, block_rows=8)
    jax.block_until_ready(y3)
    ref3 = jnp.max(x3.reshape(1, 3, 10, 2, 16, 2), axis=(3, 5))
    assert y3.shape == (1, 3, 10, 16)
    assert jnp.allclose(y3, ref3, rtol=1e-5, atol=1e-5), "max-pool mismatch (tiled grid)"

    print("KERNEL_OK")
</pallas_src>

<mosaic_0001>
module attributes {stable_mosaic.version = 11 : i64} {
  func.func @_maxpool2x2_kernel(%arg0: i32, %arg1: memref<64x32xf32, #tpu.memory_space<vmem>>, %arg2: memref<64x8xf32, #tpu.memory_space<vmem>>) attributes {dimension_semantics = [#tpu.dimension_semantics<parallel>], iteration_bounds = array<i64: 1>, scalar_prefetch = 0 : i64, scratch_operands = 0 : i64, tpu.core_type = #tpu.core_type<tc>, window_params = [{transform_indices = @transform_0, window_bounds = array<i64: 64, 32>}, {transform_indices = @transform_1, window_bounds = array<i64: 64, 8>}]} {
    %0 = tpu.iota {dimensions = array<i32: 0>} : vector<16x8xi32>
    %1 = tpu.iota {dimensions = array<i32: 1>} : vector<16x8xi32>
    %c2_i32 = arith.constant 2 : i32
    %2 = vector.broadcast %c2_i32 : i32 to vector<16x8xi32>
    %3 = arith.muli %2, %1 : vector<16x8xi32>
    %4 = arith.cmpi eq, %0, %3 : vector<16x8xi32>
    %5 = arith.extui %4 : vector<16x8xi1> to vector<16x8xi32>
    %6 = arith.sitofp %5 : vector<16x8xi32> to vector<16x8xf32>
    %c2_i32_0 = arith.constant 2 : i32
    %7 = vector.broadcast %c2_i32_0 : i32 to vector<16x8xi32>
    %8 = arith.muli %7, %1 : vector<16x8xi32>
    %c1_i32 = arith.constant 1 : i32
    %9 = vector.broadcast %c1_i32 : i32 to vector<16x8xi32>
    %10 = arith.addi %8, %9 : vector<16x8xi32>
    %11 = arith.cmpi eq, %0, %10 : vector<16x8xi32>
    %12 = arith.extui %11 : vector<16x8xi1> to vector<16x8xi32>
    %13 = arith.sitofp %12 : vector<16x8xi32> to vector<16x8xf32>
    %c0 = arith.constant 0 : index
    %c0_1 = arith.constant 0 : index
    %14 = vector.load %arg1[%c0, %c0_1] : memref<64x32xf32, #tpu.memory_space<vmem>>, vector<64x16xf32>
    %c0_2 = arith.constant 0 : index
    %c16 = arith.constant 16 : index
    %15 = vector.load %arg1[%c0_2, %c16] : memref<64x32xf32, #tpu.memory_space<vmem>>, vector<64x16xf32>
    %16 = arith.maximumf %14, %15 : vector<64x16xf32>
    %cst = arith.constant dense<0.000000e+00> : vector<64x8xf32>
    %17 = tpu.matmul %16, %6, %cst {dimension_numbers = #tpu.dot_dimension_numbers<[1], [0], [0], [1], [0, 0, 1, 1], [], []>, precision = #tpu.contract_precision<fp32>} : vector<64x16xf32>, vector<16x8xf32>, vector<64x8xf32> -> vector<64x8xf32>
    %cst_3 = arith.constant dense<0.000000e+00> : vector<64x8xf32>
    %18 = tpu.matmul %16, %13, %cst_3 {dimension_numbers = #tpu.dot_dimension_numbers<[1], [0], [0], [1], [0, 0, 1, 1], [], []>, precision = #tpu.contract_precision<fp32>} : vector<64x16xf32>, vector<16x8xf32>, vector<64x8xf32> -> vector<64x8xf32>
    %19 = arith.maximumf %17, %18 : vector<64x8xf32>
    %c0_4 = arith.constant 0 : index
    %c0_5 = arith.constant 0 : index
    %20 = vector.load %arg2[%c0_4, %c0_5] : memref<64x8xf32, #tpu.memory_space<vmem>>, vector<64x8xf32>
    tpu.vector_store %arg2[%c0_4, %c0_5], %19 {strides = array<i32>} : memref<64x8xf32, #tpu.memory_space<vmem>>, vector<64x8xf32>,
    return
  }
  func.func @transform_0(%arg0: i32) -> (i32, i32) {
    %c0_i32 = arith.constant 0 : i32
    %c0_i32_0 = arith.constant 0 : i32
    return %arg0, %c0_i32 : i32, i32
  }
  func.func @transform_1(%arg0: i32) -> (i32, i32) {
    %c0_i32 = arith.constant 0 : i32
    %c0_i32_0 = arith.constant 0 : i32
    return %arg0, %c0_i32 : i32, i32
  }
}

</mosaic_0001>

<bundles_post_ra>
// kernel: tpu_custom_call.1
= control target key start
LH: loop header
LB: loop body
LE: loop exit
PB: predicated region body
PF: predicated region fallthrough
CT: control target
= control target key end

     0   :  { %s892_s10 = smov 112   ;;  %v8_v8 = vlaneseq  ;;  %v893_v13 = vmov 0.0   ;;  %v894_v24 = vmov 1.0   ;;  %vm75_vm3 = vcmask 130048   ;;  %s1291_s0 = inlined_call_operand.vmem [shape: f32[64,32], index: 0, kind: input, shape index: {}]   ;;  %s1292_s1 = inlined_call_operand.vmem [shape: f32[64,8], index: 1, kind: output, shape index: {}]  }
   0x1   :  { %v27_v0 = vld [vmem:[%s1291_s0] sm:$0xff]  ;;  %v911_v1 = vld [vmem:[%s1291_s0 + $0x10] sm:$0xff]  ;;  %v923_v3 = vld [vmem:[%s1291_s0 + $0x8] sm:$0xff]  ;;  %vm860_vm5 = vcmask 64512  }
   0x2   :  { %43 = vrot.lane.b32.xlu0 %v27_v0, %s892_s10  ;;  %47 = vrot.lane.b32.xlu1 %v911_v1, %s892_s10  ;;  %v917_v2 = vld [vmem:[%s1291_s0 + $0x20] sm:$0xff]  ;;  %v928_v4 = vld [vmem:[%s1291_s0 + $0x18] sm:$0xff]  ;;  %v950_v9 = vshrl.u32 %v8_v8, 7  ;;  %v12_v10 = vand.u32 127, %v8_v8 }
   0x3   :  { %51 = vrot.lane.b32.xlu2 %v917_v2, %s892_s10  ;;  %v933_v5 = vld [vmem:[%s1291_s0 + $0x28] sm:$0xff]  ;;  %v941_v6 = vld [vmem:[%s1291_s0 + $0x30] sm:$0xff]  ;;  %v946_v7 = vld [vmem:[%s1291_s0 + $0x38] sm:$0xff] }
   0x4   :  { %v953_v11 = vadd.s32 8, %v950_v9  ;;  %v13_v12 = vmul.u32 2, %v12_v10 }
   0x6   :  { %vm15_vm0 = vcmp.eq.s32.totalorder %v953_v11, %v13_v12  ;;  %vm14_vm1 = vcmp.eq.s32.totalorder %v950_v9, %v13_v12  ;;  %v981_v25 = vadd.s32 1, %v13_v12 }
   0x7   :  { %v874_v14 = vsel %vm15_vm0, 1.0, %v893_v13  ;;  %v873_v16 = vsel %vm14_vm1, 1.0, %v893_v13  ;;  %879 = vmatpush.msk.msra.mxu3 %vm15_vm0, %v894_v24  ;;  %877 = vmatpush.msk.msra.mxu0 %vm15_vm0, %v894_v24 }
   0x8   :  { %v198_v15 = vsub.f32 %v874_v14, %v874_v14  ;;  %v204_v18 = vsub.f32 %v873_v16, %v873_v16  ;;  %vm22_vm2 = vcmp.eq.s32.totalorder %v953_v11, %v981_v25  ;;  %vm21_vm4 = vcmp.eq.s32.totalorder %v950_v9, %v981_v25 }
   0x9   :  { %880 = vmatpush.msk.msra.mxu3 %vm14_vm1, %v894_v24  ;;  %878 = vmatpush.msk.msra.mxu0 %vm14_vm1, %v894_v24  ;;  %v876_v26 = vsel %vm22_vm2, 1.0, %v893_v13  ;;  %v875_v50 = vsel %vm21_vm4, 1.0, %v893_v13 }
   0xa   :  { %45 = vrot.lane.b32.xlu0 %v923_v3, %s892_s10  ;;  %49 = vrot.lane.b32.xlu1 %v928_v4, %s892_s10  ;;  %v199_v17 = vand.u32 4294901760, %v198_v15  ;;  %v205_v20 = vand.u32 4294901760, %v204_v18  ;;  %v574_v27 = vsub.f32 %v876_v26, %v876_v26  ;;  %v580_v51 = vsub.f32 %v875_v50, %v875_v50 }
   0xb   :  { %53 = vrot.lane.b32.xlu2 %v933_v5, %s892_s10  ;;  %258 = vmatpush.msra.mxu2 %v198_v15 }
   0xc   :  { %v200_v19 = vsub.f32 %v198_v15, %v199_v17  ;;  %v206_v22 = vsub.f32 %v204_v18, %v205_v20  ;;  %387 = vmatpush.msrb.mxu0 %v199_v17  ;;  %v575_v28 = vand.u32 4294901760, %v574_v27  ;;  %v581_v56 = vand.u32 4294901760, %v580_v51 }
   0xd   :  { %261 = vmatpush.msra.mxu2 %v204_v18 }
   0xe   :  { %v201_v21 = vand.u32 4294901760, %v200_v19  ;;  %v207_v23 = vand.u32 4294901760, %v206_v22  ;;  %391 = vmatpush.msrb.mxu0 %v205_v20  ;;  %v576_v29 = vsub.f32 %v574_v27, %v575_v28  ;;  %v582_v58 = vsub.f32 %v580_v51, %v581_v56 }
   0xf   :  { %883 = vmatpush.msk.msrb.mxu2 %vm22_vm2, %v894_v24 }
  0x10   :  { %202 = vmatpush.msra.mxu1 %v201_v21  ;;  %v577_v30 = vand.u32 4294901760, %v576_v29  ;;  %v583_v63 = vand.u32 4294901760, %v582_v58 }
  0x11   :  { %884 = vmatpush.msk.msrb.mxu2 %vm21_vm4, %v894_v24 }
  0x12   :  { %55 = vrot.lane.b32.xlu0 %v941_v6, %s892_s10  ;;  %57 = vrot.lane.b32.xlu1 %v946_v7, %s892_s10 }
  0x13   :  { %208 = vmatpush.msra.mxu1 %v207_v23  ;;  %578 = vmatpush.msrb.mxu3 %v577_v30 }
  0x15   :  { %881 = vmatpush.msk.msrb.mxu1 %vm15_vm0, %v894_v24  ;;  %584 = vmatpush.msrb.mxu3 %v583_v63 }
  0x17   :  { %882 = vmatpush.msk.msrb.mxu1 %vm14_vm1, %v894_v24 }
  0x5d   :  { %v52_v54 = vpop.permute.xlu2 %51 }
  0x5e   :  { %v71_v62 = vmax.f32 %v917_v2, %v52_v54 }
  0x60   :  { %v89_v2 = vsel %vm75_vm3, %v71_v62, 0 }
  0x74   :  { %v44_v31 = vpop.permute.xlu0 %43  ;;  %v48_v32 = vpop.permute.xlu1 %47 }
  0x75   :  { %v67_v33 = vmax.f32 %v27_v0, %v44_v31  ;;  %v69_v36 = vmax.f32 %v911_v1, %v48_v32 }
  0x77   :  { %v77_v34 = vsel %vm75_vm3, %v67_v33, 0  ;;  %v83_v41 = vsel %vm75_vm3, %v69_v36, 0 }
  0x78   :  { %v994_v35 = vand.u32 4294901760, %v77_v34  ;;  %v1027_v46 = vand.u32 4294901760, %v83_v41 }
  0x7a   :  { %v998_v37 = vsub.f32 %v77_v34, %v994_v35  ;;  %210 = vmatmul.f32.vlgmr.msra.gmra.mxu1 %v994_v35  ;;  %v1042_v52 = vsub.f32 %v83_v41, %v1027_v46 }
  0x7b   :  { %885 = vmatpush.msk.msra.mxu1 %vm22_vm2, %v894_v24 }
  0x7c   :  { %264 = vmatmul.f32.vlgmr.msra.gmra.mxu2 %v998_v37  ;;  %v46_v38 = vpop.permute.xlu0 %45  ;;  %v1007_v39 = vand.u32 4294901760, %v998_v37  ;;  %v50_v43 = vpop.permute.xlu1 %49  ;;  %v1057_v61 = vand.u32 4294901760, %v1042_v52 }
  0x7d   :  { %v68_v40 = vmax.f32 %v923_v3, %v46_v38  ;;  %886 = vmatpush.msk.msra.mxu1 %vm21_vm4, %v894_v24  ;;  %763 = vmatpush.msra.mxu2 %v575_v28  ;;  %v70_v48 = vmax.f32 %v928_v4, %v50_v43  ;;  %v54_v3 = vpop.permute.xlu2 %53  ;;  %v1078_v4 = vand.u32 4294901760, %v89_v2 }
  0x7e   :  { %324 = vmatmul.f32.vlgmr.msra.gmra.mxu3 %v1007_v39  ;;  %v121_v42 = vsub.f32 %v998_v37, %v1007_v39  ;;  %v137_v1 = vsub.f32 %v1042_v52, %v1057_v61  ;;  %v72_v12 = vmax.f32 %v933_v5, %v54_v3 }
  0x7f   :  { %v80_v44 = vsel %vm75_vm3, %v68_v40, 0  ;;  %v86_v55 = vsel %vm75_vm3, %v70_v48, 0  ;;  %767 = vmatpush.msra.mxu2 %v581_v56  ;;  %887 = vmatpush.msk.msra.mxu3 %vm22_vm2, %v894_v24  ;;  %v1086_v11 = vsub.f32 %v89_v2, %v1078_v4 }
  0x80   :  { %v1025_v45 = vand.u32 4294901760, %v80_v44  ;;  %v1029_v47 = vand.u32 4294901760, %v121_v42  ;;  %v1052_v59 = vand.u32 4294901760, %v86_v55  ;;  %v138_v8 = vand.u32 4294901760, %v137_v1 }
  0x81   :  { %888 = vmatpush.msk.msra.mxu3 %vm21_vm4, %v894_v24  ;;  %v92_v13 = vsel %vm75_vm3, %v72_v12, 0  ;;  %v1096_v5 = vand.u32 4294901760, %v1086_v11 }
  0x82   :  { %v1033_v49 = vsub.f32 %v80_v44, %v1025_v45  ;;  %123 = vmatmul.f32.vlgmr.msra.gmra.mxu0 %v1029_v47  ;;  %214 = vmatmul.f32.gmra.mxu1 %v1025_v45  ;;  %v1063_v0 = vsub.f32 %v86_v55, %v1052_v59  ;;  %v1093_v15 = vand.u32 4294901760, %v92_v13 }
  0x83   :  { %634 = vmatpush.msra.mxu0 %v574_v27  ;;  %v153_v19 = vsub.f32 %v1086_v11, %v1096_v5 }
  0x84   :  { %269 = vmatmul.f32.gmra.mxu2 %v1033_v49  ;;  %v1046_v53 = vand.u32 4294901760, %v1033_v49  ;;  %v1081_v10 = vand.u32 4294901760, %v1063_v0  ;;  %v56_v14 = vpop.permute.xlu0 %55  ;;  %v1101_v18 = vsub.f32 %v92_v13, %v1093_v15  ;;  %v58_v21 = vpop.permute.xlu1 %57 }
  0x85   :  { %637 = vmatpush.msra.mxu0 %v580_v51  ;;  %v73_v17 = vmax.f32 %v941_v6, %v56_v14  ;;  %v154_v23 = vand.u32 4294901760, %v153_v19  ;;  %v74_v24 = vmax.f32 %v946_v7, %v58_v21 }
  0x86   :  { %330 = vmatmul.f32.gmra.mxu3 %v1046_v53  ;;  %v129_v57 = vsub.f32 %v1033_v49, %v1046_v53  ;;  %v145_v9 = vsub.f32 %v1063_v0, %v1081_v10  ;;  %v1111_v6 = vand.u32 4294901760, %v1101_v18 }
  0x87   :  { %v95_v20 = vsel %vm75_vm3, %v73_v17, 0  ;;  %v98_v27 = vsel %vm75_vm3, %v74_v24, 0 }
  0x88   :  { %v1054_v60 = vand.u32 4294901760, %v129_v57  ;;  %v146_v16 = vand.u32 4294901760, %v145_v9  ;;  %v1108_v22 = vand.u32 4294901760, %v95_v20  ;;  %v161_v26 = vsub.f32 %v1101_v18, %v1111_v6 }
  0x89   :  { %v1123_v28 = vand.u32 4294901760, %v98_v27 }
  0x8a   :  { %131 = vmatmul.f32.gmra.mxu0 %v1054_v60  ;;  %218 = vmatmul.f32.gmra.mxu1 %v1027_v46  ;;  %v1116_v25 = vsub.f32 %v95_v20, %v1108_v22  ;;  %v162_v29 = vand.u32 4294901760, %v161_v26 }
  0x8b   :  { %v1130_v30 = vsub.f32 %v98_v27, %v1123_v28 }
  0x8c   :  { %274 = vmatmul.f32.gmra.mxu2 %v1042_v52  ;;  %v1126_v7 = vand.u32 4294901760, %v1116_v25 }
  0x8d   :  { %v1137_v33 = vand.u32 4294901760, %v1130_v30 }
  0x8e   :  { %336 = vmatmul.f32.gmra.mxu3 %v1057_v61  ;;  %v169_v31 = vsub.f32 %v1116_v25, %v1126_v7 }
  0x8f   :  { %v177_v34 = vsub.f32 %v1130_v30, %v1137_v33 }
  0x90   :  { %v170_v32 = vand.u32 4294901760, %v169_v31 }
  0x91   :  { %v178_v36 = vand.u32 4294901760, %v177_v34 }
  0x92   :  { %139 = vmatmul.f32.gmra.mxu0 %v138_v8  ;;  %222 = vmatmul.f32.gmra.mxu1 %v1052_v59 }
  0x94   :  { %279 = vmatmul.f32.gmra.mxu2 %v1063_v0 }
  0x96   :  { %342 = vmatmul.f32.gmra.mxu3 %v1081_v10 }
  0x9a   :  { %147 = vmatmul.f32.gmra.mxu0 %v146_v16  ;;  %226 = vmatmul.f32.gmra.mxu1 %v1078_v4 }
  0x9c   :  { %284 = vmatmul.f32.gmra.mxu2 %v1086_v11 }
  0x9e   :  { %348 = vmatmul.f32.gmra.mxu3 %v1096_v5 }
  0xa2   :  { %155 = vmatmul.f32.gmra.mxu0 %v154_v23  ;;  %230 = vmatmul.f32.gmra.mxu1 %v1093_v15 }
  0xa4   :  { %289 = vmatmul.f32.gmra.mxu2 %v1101_v18 }
  0xa6   :  { %354 = vmatmul.f32.gmra.mxu3 %v1111_v6 }
  0xaa   :  { %163 = vmatmul.f32.gmra.mxu0 %v162_v29  ;;  %234 = vmatmul.f32.gmra.mxu1 %v1108_v22 }
  0xac   :  { %294 = vmatmul.f32.gmra.mxu2 %v1116_v25 }
  0xae   :  { %360 = vmatmul.f32.gmra.mxu3 %v1126_v7 }
  0xb2   :  { %171 = vmatmul.f32.gmra.mxu0 %v170_v32  ;;  %238 = vmatmul.f32.gmra.mxu1 %v1123_v28 }
  0xb4   :  { %299 = vmatmul.f32.gmra.mxu2 %v1130_v30 }
  0xb6   :  { %366 = vmatmul.f32.gmra.mxu3 %v1137_v33 }
  0xba   :  { %179 = vmatmul.f32.gmra.mxu0 %v178_v36  ;;  %444 = vmatmul.f32.vlgmr.msrb.gmra.mxu1 %v994_v35 }
  0xbc   :  { %499 = vmatmul.f32.vlgmr.msrb.gmra.mxu2 %v1029_v47 }
  0xbe   :  { %586 = vmatmul.f32.vlgmr.msrb.gmra.mxu3 %v994_v35 }
  0xc2   :  { %393 = vmatmul.f32.vlgmr.msrb.gmra.mxu0 %v994_v35  ;;  %448 = vmatmul.f32.gmra.mxu1 %v1025_v45 }
  0xc4   :  { %507 = vmatmul.f32.gmra.mxu2 %v1054_v60 }
  0xc6   :  { %590 = vmatmul.f32.gmra.mxu3 %v1025_v45 }
  0xca   :  { %397 = vmatmul.f32.gmra.mxu0 %v1025_v45  ;;  %452 = vmatmul.f32.gmra.mxu1 %v1027_v46 }
  0xcc   :  { %515 = vmatmul.f32.gmra.mxu2 %v138_v8 }
  0xce   :  { %594 = vmatmul.f32.gmra.mxu3 %v1027_v46 }
  0xd2   :  { %401 = vmatmul.f32.gmra.mxu0 %v1027_v46  ;;  %456 = vmatmul.f32.gmra.mxu1 %v1052_v59 }
  0xd4   :  { %523 = vmatmul.f32.gmra.mxu2 %v146_v16 }
  0xd6   :  { %598 = vmatmul.f32.gmra.mxu3 %v1052_v59 }
  0xda   :  { %405 = vmatmul.f32.gmra.mxu0 %v1052_v59  ;;  %460 = vmatmul.f32.gmra.mxu1 %v1078_v4 }
  0xdc   :  { %531 = vmatmul.f32.gmra.mxu2 %v154_v23 }
  0xde   :  { %602 = vmatmul.f32.gmra.mxu3 %v1078_v4 }
  0xe2   :  { %409 = vmatmul.f32.gmra.mxu0 %v1078_v4  ;;  %464 = vmatmul.f32.gmra.mxu1 %v1093_v15 }
  0xe4   :  { %539 = vmatmul.f32.gmra.mxu2 %v162_v29 }
  0xe6   :  { %606 = vmatmul.f32.gmra.mxu3 %v1093_v15 }
  0xea   :  { %413 = vmatmul.f32.gmra.mxu0 %v1093_v15  ;;  %468 = vmatmul.f32.gmra.mxu1 %v1108_v22 }
  0xec   :  { %547 = vmatmul.f32.gmra.mxu2 %v170_v32 }
  0xee   :  { %610 = vmatmul.f32.gmra.mxu3 %v1108_v22 }
  0xf2   :  { %417 = vmatmul.f32.gmra.mxu0 %v1108_v22  ;;  %472 = vmatmul.f32.gmra.mxu1 %v1123_v28 }
  0xf4   :  { %555 = vmatmul.f32.gmra.mxu2 %v178_v36 }
  0xf6   :  { %614 = vmatmul.f32.gmra.mxu3 %v1123_v28 }
  0xf7   :  { %v211_v38 = vpop.f32.mrf.mxu1 }
  0xfa   :  { %421 = vmatmul.f32.gmra.mxu0 %v1123_v28  ;;  %700 = vmatmul.f32.vlgmr.msra.gmra.mxu1 %v1007_v39 }
  0xfc   :  { %769 = vmatmul.f32.vlgmr.msra.gmra.mxu2 %v994_v35 }
  0xfe   :  { %820 = vmatmul.f32.vlgmr.msra.gmra.mxu3 %v994_v35 }
  0xff   :  { %v124_v40 = vpop.f32.mrf.mxu0  ;;  %v215_v41 = vpop.f32.mrf.mxu1 }
 0x100   :  { %v212_v42 = vadd.f32 %v211_v38, %v124_v40  ;;  %v265_v43 = vpop.f32.mrf.mxu2 }
 0x101   :  { %v325_v44 = vpop.f32.mrf.mxu3 }
 0x102   :  { %v266_v47 = vadd.f32 %v265_v43, %v212_v42  ;;  %640 = vmatmul.f32.vlgmr.msra.gmra.mxu0 %v998_v37  ;;  %706 = vmatmul.f32.gmra.mxu1 %v1046_v53 }
 0x104   :  { %v1175_v48 = vadd.f32 %v325_v44, %v266_v47  ;;  %773 = vmatmul.f32.gmra.mxu2 %v1025_v45 }
 0x106   :  { %824 = vmatmul.f32.gmra.mxu3 %v1025_v45 }
 0x107   :  { %v132_v39 = vpop.f32.mrf.mxu0  ;;  %v219_v50 = vpop.f32.mrf.mxu1 }
 0x108   :  { %v216_v51 = vadd.f32 %v215_v41, %v132_v39  ;;  %v270_v35 = vpop.f32.mrf.mxu2 }
 0x109   :  { %v331_v54 = vpop.f32.mrf.mxu3 }
 0x10a   :  { %v271_v55 = vadd.f32 %v270_v35, %v216_v51  ;;  %645 = vmatmul.f32.gmra.mxu0 %v1033_v49  ;;  %712 = vmatmul.f32.gmra.mxu1 %v1057_v61 }
 0x10c   :  { %v1181_v56 = vadd.f32 %v331_v54, %v271_v55  ;;  %777 = vmatmul.f32.gmra.mxu2 %v1027_v46 }
 0x10e   :  { %828 = vmatmul.f32.gmra.mxu3 %v1027_v46 }
 0x10f   :  { %v140_v37 = vpop.f32.mrf.mxu0  ;;  %v223_v53 = vpop.f32.mrf.mxu1 }
 0x110   :  { %v220_v57 = vadd.f32 %v219_v50, %v140_v37  ;;  %v275_v45 = vpop.f32.mrf.mxu2 }
 0x111   :  { %v337_v58 = vpop.f32.mrf.mxu3 }
 0x112   :  { %v276_v60 = vadd.f32 %v275_v45, %v220_v57  ;;  %650 = vmatmul.f32.gmra.mxu0 %v1042_v52  ;;  %718 = vmatmul.f32.gmra.mxu1 %v1081_v10 }
 0x114   :  { %v1187_v62 = vadd.f32 %v337_v58, %v276_v60  ;;  %781 = vmatmul.f32.gmra.mxu2 %v1052_v59 }
 0x116   :  { %832 = vmatmul.f32.gmra.mxu3 %v1052_v59 }
 0x117   :  { %v148_v49 = vpop.f32.mrf.mxu0  ;;  %v227_v61 = vpop.f32.mrf.mxu1 }
 0x118   :  { %v224_v63 = vadd.f32 %v223_v53, %v148_v49  ;;  %v280_v46 = vpop.f32.mrf.mxu2 }
 0x119   :  { %v343_v1 = vpop.f32.mrf.mxu3 }
 0x11a   :  { %v281_v2 = vadd.f32 %v280_v46, %v224_v63  ;;  %655 = vmatmul.f32.gmra.mxu0 %v1063_v0  ;;  %724 = vmatmul.f32.gmra.mxu1 %v1096_v5 }
 0x11c   :  { %v1193_v3 = vadd.f32 %v343_v1, %v281_v2  ;;  %785 = vmatmul.f32.gmra.mxu2 %v1078_v4 }
 0x11e   :  { %836 = vmatmul.f32.gmra.mxu3 %v1078_v4 }
 0x11f   :  { %v156_v52 = vpop.f32.mrf.mxu0  ;;  %v231_v8 = vpop.f32.mrf.mxu1 }
 0x120   :  { %v228_v10 = vadd.f32 %v227_v61, %v156_v52  ;;  %v285_v59 = vpop.f32.mrf.mxu2 }
 0x121   :  { %v349_v12 = vpop.f32.mrf.mxu3 }
 0x122   :  { %v286_v9 = vadd.f32 %v285_v59, %v228_v10  ;;  %660 = vmatmul.f32.gmra.mxu0 %v1086_v11  ;;  %730 = vmatmul.f32.gmra.mxu1 %v1111_v6 }
 0x124   :  { %v350_v13 = vadd.f32 %v349_v12, %v286_v9  ;;  %789 = vmatmul.f32.gmra.mxu2 %v1093_v15 }
 0x126   :  { %840 = vmatmul.f32.gmra.mxu3 %v1093_v15 }
 0x127   :  { %v164_v0 = vpop.f32.mrf.mxu0  ;;  %v235_v14 = vpop.f32.mrf.mxu1 }
 0x128   :  { %v232_v16 = vadd.f32 %v231_v8, %v164_v0  ;;  %v290_v5 = vpop.f32.mrf.mxu2 }
 0x129   :  { %v355_v4 = vpop.f32.mrf.mxu3 }
 0x12a   :  { %v291_v17 = vadd.f32 %v290_v5, %v232_v16  ;;  %665 = vmatmul.f32.gmra.mxu0 %v1101_v18  ;;  %736 = vmatmul.f32.gmra.mxu1 %v1126_v7 }
 0x12c   :  { %v356_v19 = vadd.f32 %v355_v4, %v291_v17  ;;  %793 = vmatmul.f32.gmra.mxu2 %v1108_v22 }
 0x12e   :  { %844 = vmatmul.f32.gmra.mxu3 %v1108_v22 }
 0x12f   :  { %v172_v11 = vpop.f32.mrf.mxu0  ;;  %v239_v20 = vpop.f32.mrf.mxu1 }
 0x130   :  { %v236_v21 = vadd.f32 %v235_v14, %v172_v11  ;;  %v295_v23 = vpop.f32.mrf.mxu2 }
 0x131   :  { %v361_v15 = vpop.f32.mrf.mxu3 }
 0x132   :  { %v296_v6 = vadd.f32 %v295_v23, %v236_v21  ;;  %670 = vmatmul.f32.gmra.mxu0 %v1116_v25  ;;  %742 = vmatmul.f32.gmra.mxu1 %v1137_v33 }
 0x134   :  { %v362_v24 = vadd.f32 %v361_v15, %v296_v6  ;;  %797 = vmatmul.f32.gmra.mxu2 %v1123_v28 }
 0x136   :  { %848 = vmatmul.f32.gmra.mxu3 %v1123_v28 }
 0x137   :  { %v180_v18 = vpop.f32.mrf.mxu0  ;;  %v445_v26 = vpop.f32.mrf.mxu1 }
 0x138   :  { %v240_v27 = vadd.f32 %v239_v20, %v180_v18  ;;  %v300_v29 = vpop.f32.mrf.mxu2 }
 0x139   :  { %v367_v22 = vpop.f32.mrf.mxu3 }
 0x13a   :  { %v301_v7 = vadd.f32 %v300_v29, %v240_v27  ;;  %675 = vmatmul.f32.gmra.mxu0 %v1130_v30 }
 0x13c   :  { %v368_v31 = vadd.f32 %v367_v22, %v301_v7 }
 0x13f   :  { %v394_v32 = vpop.f32.mrf.mxu0  ;;  %v449_v34 = vpop.f32.mrf.mxu1 }
 0x140   :  { %v395_v25 = vadd.f32 %v394_v32, %v1175_v48  ;;  %v500_v36 = vpop.f32.mrf.mxu2 }
 0x141   :  { %v587_v33 = vpop.f32.mrf.mxu3 }
 0x142   :  { %v446_v38 = vadd.f32 %v445_v26, %v395_v25  ;;  %v588_v17 = vadd.f32 %v587_v33, %v500_v36 }
 0x147   :  { %v398_v40 = vpop.f32.mrf.mxu0  ;;  %v453_v41 = vpop.f32.mrf.mxu1 }
 0x148   :  { %v399_v28 = vadd.f32 %v398_v40, %v1181_v56  ;;  %v508_v42 = vpop.f32.mrf.mxu2 }
 0x149   :  { %v591_v43 = vpop.f32.mrf.mxu3 }
 0x14a   :  { %v1212_v44 = vadd.f32 %v449_v34, %v399_v28 }
 0x14f   :  { %v402_v47 = vpop.f32.mrf.mxu0  ;;  %v457_v39 = vpop.f32.mrf.mxu1 }
 0x150   :  { %v403_v30 = vadd.f32 %v402_v47, %v1187_v62  ;;  %v516_v50 = vpop.f32.mrf.mxu2 }
 0x151   :  { %v595_v51 = vpop.f32.mrf.mxu3 }
 0x152   :  { %v1215_v35 = vadd.f32 %v453_v41, %v403_v30  ;;  %v596_v25 = vadd.f32 %v595_v51, %v516_v50 }
 0x157   :  { %v406_v48 = vpop.f32.mrf.mxu0  ;;  %v461_v54 = vpop.f32.mrf.mxu1 }
 0x158   :  { %v407_v55 = vadd.f32 %v406_v48, %v1193_v3  ;;  %v524_v37 = vpop.f32.mrf.mxu2 }
 0x159   :  { %v599_v53 = vpop.f32.mrf.mxu3 }
 0x15a   :  { %v1218_v57 = vadd.f32 %v457_v39, %v407_v55  ;;  %v600_v39 = vadd.f32 %v599_v53, %v524_v37 }
 0x15f   :  { %v410_v56 = vpop.f32.mrf.mxu0  ;;  %v465_v45 = vpop.f32.mrf.mxu1 }
 0x160   :  { %v411_v58 = vadd.f32 %v410_v56, %v350_v13  ;;  %v1220_v60 = vpop.f32.mrf.mxu2 }
 0x161   :  { %v1222_v49 = vpop.f32.mrf.mxu3 }
 0x162   :  { %v1224_v62 = vadd.f32 %v461_v54, %v411_v58  ;;  %v604_v58 = vadd.f32 %v1222_v49, %v1220_v60 }
 0x167   :  { %v414_v61 = vpop.f32.mrf.mxu0  ;;  %v469_v63 = vpop.f32.mrf.mxu1 }
 0x168   :  { %v415_v46 = vadd.f32 %v414_v61, %v356_v19  ;;  %v1226_v1 = vpop.f32.mrf.mxu2 }
 0x169   :  { %v1228_v2 = vpop.f32.mrf.mxu3 }
 0x16a   :  { %v1230_v3 = vadd.f32 %v465_v45, %v415_v46 }
 0x16f   :  { %v418_v52 = vpop.f32.mrf.mxu0  ;;  %v473_v8 = vpop.f32.mrf.mxu1 }
 0x170   :  { %v419_v10 = vadd.f32 %v418_v52, %v362_v24  ;;  %v1232_v59 = vpop.f32.mrf.mxu2  ;;  %v592_v24 = vadd.f32 %v591_v43, %v508_v42 }
 0x171   :  { %v1234_v12 = vpop.f32.mrf.mxu3 }
 0x172   :  { %v1236_v9 = vadd.f32 %v469_v63, %v419_v10 }
 0x177   :  { %v422_v13 = vpop.f32.mrf.mxu0  ;;  %v701_v0 = vpop.f32.mrf.mxu1 }
 0x178   :  { %v423_v14 = vadd.f32 %v422_v13, %v368_v31  ;;  %v1238_v16 = vpop.f32.mrf.mxu2  ;;  %v608_v13 = vadd.f32 %v1228_v2, %v1226_v1 }
 0x179   :  { %v1240_v5 = vpop.f32.mrf.mxu3 }
 0x17a   :  { %v1242_v4 = vadd.f32 %v473_v8, %v423_v14 }
 0x17f   :  { %v641_v19 = vpop.f32.mrf.mxu0  ;;  %v707_v11 = vpop.f32.mrf.mxu1 }
 0x180   :  { %v642_v20 = vadd.f32 %v641_v19, %v588_v17  ;;  %v770_v21 = vpop.f32.mrf.mxu2 }
 0x181   :  { %v821_v23 = vpop.f32.mrf.mxu3 }
 0x182   :  { %v702_v15 = vadd.f32 %v701_v0, %v642_v20  ;;  %v612_v20 = vadd.f32 %v1234_v12, %v1232_v59 }
 0x184   :  { %v771_v6 = vadd.f32 %v770_v21, %v702_v15 }
 0x186   :  { %v822_v18 = vadd.f32 %v821_v23, %v771_v6 }
 0x187   :  { %v646_v26 = vpop.f32.mrf.mxu0  ;;  %v713_v27 = vpop.f32.mrf.mxu1 }
 0x188   :  { %v852_v29 = vmax.f32 %v446_v38, %v822_v18  ;;  %v647_v22 = vadd.f32 %v646_v26, %v592_v24  ;;  %v774_v7 = vpop.f32.mrf.mxu2  ;;  %v616_v26 = vadd.f32 %v1240_v5, %v1238_v16 }
 0x189   :  { %v825_v31 = vpop.f32.mrf.mxu3 }
 0x18a   :  { %861 = vst.msk [vmem:[%s1292_s1] sm:$0xff] %vm860_vm5, %v852_v29  ;;  %v708_v32 = vadd.f32 %v707_v11, %v647_v22 }
 0x18c   :  { %v775_v34 = vadd.f32 %v774_v7, %v708_v32 }
 0x18e   :  { %v826_v36 = vadd.f32 %v825_v31, %v775_v34 }
 0x18f   :  { %v651_v33 = vpop.f32.mrf.mxu0  ;;  %v719_v42 = vpop.f32.mrf.mxu1 }
 0x190   :  { %v853_v40 = vmax.f32 %v1212_v44, %v826_v36  ;;  %v652_v41 = vadd.f32 %v651_v33, %v596_v25  ;;  %v778_v28 = vpop.f32.mrf.mxu2 }
 0x191   :  { %v829_v43 = vpop.f32.mrf.mxu3 }
 0x192   :  { %862 = vst.msk [vmem:[%s1292_s1 + $0x8] sm:$0xff] %vm860_vm5, %v853_v40  ;;  %v714_v38 = vadd.f32 %v713_v27, %v652_v41 }
 0x194   :  { %v779_v47 = vadd.f32 %v778_v28, %v714_v38 }
 0x196   :  { %v830_v30 = vadd.f32 %v829_v43, %v779_v47 }
 0x197   :  { %v656_v48 = vpop.f32.mrf.mxu0  ;;  %v725_v56 = vpop.f32.mrf.mxu1 }
 0x198   :  { %v854_v50 = vmax.f32 %v1215_v35, %v830_v30  ;;  %v657_v51 = vadd.f32 %v656_v48, %v600_v39  ;;  %v782_v54 = vpop.f32.mrf.mxu2 }
 0x199   :  { %v833_v55 = vpop.f32.mrf.mxu3 }
 0x19a   :  { %863 = vst.msk [vmem:[%s1292_s1 + $0x10] sm:$0xff] %vm860_vm5, %v854_v50  ;;  %v720_v44 = vadd.f32 %v719_v42, %v657_v51 }
 0x19c   :  { %v783_v45 = vadd.f32 %v782_v54, %v720_v44 }
 0x19e   :  { %v834_v61 = vadd.f32 %v833_v55, %v783_v45 }
 0x19f   :  { %v661_v37 = vpop.f32.mrf.mxu0  ;;  %v731_v10 = vpop.f32.mrf.mxu1 }
 0x1a0   :  { %v855_v53 = vmax.f32 %v1218_v57, %v834_v61  ;;  %v662_v63 = vadd.f32 %v661_v37, %v604_v58  ;;  %v786_v35 = vpop.f32.mrf.mxu2 }
 0x1a1   :  { %v837_v46 = vpop.f32.mrf.mxu3 }
 0x1a2   :  { %864 = vst.msk [vmem:[%s1292_s1 + $0x18] sm:$0xff] %vm860_vm5, %v855_v53  ;;  %v726_v52 = vadd.f32 %v725_v56, %v662_v63 }
 0x1a4   :  { %v787_v8 = vadd.f32 %v786_v35, %v726_v52 }
 0x1a6   :  { %v838_v0 = vadd.f32 %v837_v46, %v787_v8 }
 0x1a7   :  { %v666_v60 = vpop.f32.mrf.mxu0  ;;  %v737_v23 = vpop.f32.mrf.mxu1 }
 0x1a8   :  { %v856_v49 = vmax.f32 %v1224_v62, %v838_v0  ;;  %v667_v14 = vadd.f32 %v666_v60, %v608_v13  ;;  %v790_v57 = vpop.f32.mrf.mxu2 }
 0x1a9   :  { %v841_v17 = vpop.f32.mrf.mxu3 }
 0x1aa   :  { %865 = vst.msk [vmem:[%s1292_s1 + $0x20] sm:$0xff] %vm860_vm5, %v856_v49  ;;  %v732_v19 = vadd.f32 %v731_v10, %v667_v14 }
 0x1ac   :  { %v791_v11 = vadd.f32 %v790_v57, %v732_v19 }
 0x1ae   :  { %v842_v21 = vadd.f32 %v841_v17, %v791_v11 }
 0x1af   :  { %v671_v1 = vpop.f32.mrf.mxu0  ;;  %v743_v22 = vpop.f32.mrf.mxu1 }
 0x1b0   :  { %v857_v2 = vmax.f32 %v1230_v3, %v842_v21  ;;  %v672_v15 = vadd.f32 %v671_v1, %v612_v20  ;;  %v794_v62 = vpop.f32.mrf.mxu2 }
 0x1b1   :  { %v845_v24 = vpop.f32.mrf.mxu3 }
 0x1b2   :  { %866 = vst.msk [vmem:[%s1292_s1 + $0x28] sm:$0xff] %vm860_vm5, %v857_v2  ;;  %v738_v6 = vadd.f32 %v737_v23, %v672_v15 }
 0x1b4   :  { %v795_v18 = vadd.f32 %v794_v62, %v738_v6 }
 0x1b6   :  { %v846_v27 = vadd.f32 %v845_v24, %v795_v18 }
 0x1b7   :  { %v676_v59 = vpop.f32.mrf.mxu0 }
 0x1b8   :  { %v858_v12 = vmax.f32 %v1236_v9, %v846_v27  ;;  %v677_v29 = vadd.f32 %v676_v59, %v616_v26  ;;  %v798_v7 = vpop.f32.mrf.mxu2 }
 0x1b9   :  { %v849_v32 = vpop.f32.mrf.mxu3 }
 0x1ba   :  { %867 = vst.msk [vmem:[%s1292_s1 + $0x30] sm:$0xff] %vm860_vm5, %v858_v12  ;;  %v744_v3 = vadd.f32 %v743_v22, %v677_v29 }
 0x1bc   :  { %v799_v31 = vadd.f32 %v798_v7, %v744_v3 }
 0x1be   :  { %v850_v34 = vadd.f32 %v849_v32, %v799_v31 }
 0x1c0   :  { %v859_v25 = vmax.f32 %v1242_v4, %v850_v34 }
 0x1c2   :  { %868 = vst.msk [vmem:[%s1292_s1 + $0x38] sm:$0xff] %vm860_vm5, %v859_v25 }

</bundles_post_ra>
